<compile_context>
chip_gen: v7x
topology: tpu7x:2x2x1
jax: 0.10.0
libtpu: 0.0.40
codegen_flags: <defaults>
</compile_context>

<pallas_src>
import jax
import jax.numpy as jnp
from jax.experimental import pallas as pl
from jax.experimental.pallas import tpu as pltpu

# True (PyTorch) dims
D_IN, D_H1, D_H2, D_OUT = 1, 1000, 100, 1
# Lane-padded hidden dims (feature axis on lanes)
P_H1, P_H2 = 1024, 128

# TILE_B=1024 keeps the (TILE_B, P_H1) f32 intermediate (~4 MiB) + bf16 copy
# (~2 MiB) + weights (<1 MiB) well under the default scoped VMEM on all of
# v5e/v6e/v7x (64 MiB physical on v7x), so no explicit vmem_limit_bytes needed.
TILE_B_MAX = 1024


def _round_up(n, m):
    return ((n + m - 1) // m) * m


def _mlp_kernel(x_ref, w1_ref, b1_ref, w2_ref, b2_ref, w3_ref, b3_ref, o_ref):
    x = x_ref[...]                                             # (TB, 1) f32
    # Layer 1: D_IN == 1, so x @ W1 is just a broadcast multiply (VPU).
    a1 = jnp.maximum(x * w1_ref[...] + b1_ref[...], 0.0)       # (TB, P_H1)
    # Layer 2: the only real matmul -> MXU, bf16 in, f32 accumulate.
    z2 = jnp.dot(a1.astype(w2_ref.dtype), w2_ref[...],
                 preferred_element_type=jnp.float32)           # (TB, P_H2)
    a2 = jnp.maximum(z2 + b2_ref[...], 0.0)
    # Layer 3: D_OUT == 1, so a2 @ W3 is a lane reduction (XLU).
    z3 = jnp.sum(a2 * w3_ref[...], axis=-1, keepdims=True) + b3_ref[...]
    o_ref[...] = z3.astype(o_ref.dtype)                        # (TB, 1)


def prepare_params(params, *, w2_dtype=jnp.bfloat16):
    """One-time padding / layout prep (hoisted out of the hot forward path)."""
    w1, b1, w2, b2, w3, b3 = params
    w1_row = jnp.zeros((1, P_H1), jnp.float32).at[0, :D_H1].set(w1.reshape(-1))
    b1_row = jnp.zeros((1, P_H1), jnp.float32).at[0, :D_H1].set(b1)
    w2p = (jnp.zeros((P_H1, P_H2), jnp.float32)
           .at[:D_H1, :D_H2].set(w2).astype(w2_dtype))
    b2_row = jnp.zeros((1, P_H2), jnp.float32).at[0, :D_H2].set(b2)
    w3_row = jnp.zeros((1, P_H2), jnp.float32).at[0, :D_H2].set(w3.reshape(-1))
    b3_s = jnp.asarray(b3, jnp.float32).reshape(1, 1)
    return (w1_row, b1_row, w2p, b2_row, w3_row, b3_s)


def lognn_forward(x, prepared, *, tile_b_max=TILE_B_MAX):
    """x: (B, 1) float32. Returns (B, 1) float32."""
    w1_row, b1_row, w2p, b2_row, w3_row, b3_s = prepared
    B = x.shape[0]

    tile_b = min(tile_b_max, _round_up(B, 8))   # sublane-aligned batch tile
    Bp = _round_up(B, tile_b)
    xp = x if Bp == B else jnp.zeros((Bp, D_IN), x.dtype).at[:B, :].set(x)

    const = lambda shape: pl.BlockSpec(shape, lambda i: (0, 0))

    out = pl.pallas_call(
        _mlp_kernel,
        out_shape=jax.ShapeDtypeStruct((Bp, D_OUT), jnp.float32),
        grid=(Bp // tile_b,),
        in_specs=[
            pl.BlockSpec((tile_b, D_IN), lambda i: (i, 0)),   # x: streamed
            const((1, P_H1)),        # w1 row  (VMEM-resident)
            const((1, P_H1)),        # b1 row
            const((P_H1, P_H2)),     # w2 (bf16)
            const((1, P_H2)),        # b2 row
            const((1, P_H2)),        # w3 row
            const((1, 1)),           # b3 scalar
        ],
        out_specs=pl.BlockSpec((tile_b, D_OUT), lambda i: (i, 0)),
        compiler_params=pltpu.CompilerParams(
            dimension_semantics=("parallel",)),
    )(xp, w1_row, b1_row, w2p, b2_row, w3_row, b3_s)

    return out[:B]


def init_params(key):
    """Deterministic init mimicking nn.Linear default (U[-1/sqrt(fan_in), 1/sqrt(fan_in)])."""
    ks = jax.random.split(key, 6)

    def lin(kw, kb, fan_in, fan_out):
        bound = 1.0 / jnp.sqrt(fan_in)
        w = jax.random.uniform(kw, (fan_in, fan_out), jnp.float32, -bound, bound)
        b = jax.random.uniform(kb, (fan_out,), jnp.float32, -bound, bound)
        return w, b

    w1, b1 = lin(ks[0], ks[1], D_IN, D_H1)
    w2, b2 = lin(ks[2], ks[3], D_H1, D_H2)
    w3, b3 = lin(ks[4], ks[5], D_H2, D_OUT)
    return (w1, b1, w2, b2, w3, b3)


def reference_forward(x, params):
    w1, b1, w2, b2, w3, b3 = params
    a1 = jnp.maximum(x @ w1 + b1, 0.0)
    a2 = jnp.maximum(a1 @ w2 + b2, 0.0)
    return a2 @ w3 + b3


if __name__ == "__main__":
    key = jax.random.PRNGKey(0)
    kp, kx, kx2 = jax.random.split(key, 3)
    params = init_params(kp)
    prepared = prepare_params(params)   # one-time prep, outside the hot path

    # Small test (single tile).
    B = 8
    x = jax.random.normal(kx, (B, D_IN), jnp.float32)
    y = jax.block_until_ready(lognn_forward(x, prepared))
    y_ref = reference_forward(x, params)
    assert y.shape == (B, D_OUT)
    # bf16 layer-2 weights/activations -> loosened tolerance vs f32 reference.
    assert jnp.allclose(y, y_ref, atol=5e-2, rtol=5e-2)

    # Exercise the batch grid + batch padding (grid of 4 tiles of 64 rows).
    B2 = 200
    x2 = jax.random.normal(kx2, (B2, D_IN), jnp.float32)
    y2 = jax.block_until_ready(lognn_forward(x2, prepared, tile_b_max=64))
    y2_ref = reference_forward(x2, params)
    assert y2.shape == (B2, D_OUT)
    assert jnp.allclose(y2, y2_ref, atol=5e-2, rtol=5e-2)

    print("KERNEL_OK")
</pallas_src>

<mosaic_0001>
module attributes {stable_mosaic.version = 11 : i64} {
  func.func @_mlp_kernel(%arg0: i32, %arg1: memref<8x1xf32, #tpu.memory_space<vmem>>, %arg2: memref<1x1024xf32, #tpu.memory_space<vmem>>, %arg3: memref<1x1024xf32, #tpu.memory_space<vmem>>, %arg4: memref<1024x128xbf16, #tpu.memory_space<vmem>>, %arg5: memref<1x128xf32, #tpu.memory_space<vmem>>, %arg6: memref<1x128xf32, #tpu.memory_space<vmem>>, %arg7: memref<1x1xf32, #tpu.memory_space<vmem>>, %arg8: memref<8x1xf32, #tpu.memory_space<vmem>>) attributes {dimension_semantics = [#tpu.dimension_semantics<parallel>], iteration_bounds = array<i64: 1>, scalar_prefetch = 0 : i64, scratch_operands = 0 : i64, tpu.core_type = #tpu.core_type<tc>, window_params = [{transform_indices = @transform_0, window_bounds = array<i64: 8, 1>}, {pipeline_mode = #tpu.pipeline_mode<synchronous>, transform_indices = @transform_1, window_bounds = array<i64: 1, 1024>}, {pipeline_mode = #tpu.pipeline_mode<synchronous>, transform_indices = @transform_2, window_bounds = array<i64: 1, 1024>}, {pipeline_mode = #tpu.pipeline_mode<synchronous>, transform_indices = @transform_3, window_bounds = array<i64: 1024, 128>}, {pipeline_mode = #tpu.pipeline_mode<synchronous>, transform_indices = @transform_4, window_bounds = array<i64: 1, 128>}, {pipeline_mode = #tpu.pipeline_mode<synchronous>, transform_indices = @transform_5, window_bounds = array<i64: 1, 128>}, {pipeline_mode = #tpu.pipeline_mode<synchronous>, transform_indices = @transform_6, window_bounds = array<i64: 1, 1>}, {transform_indices = @transform_7, window_bounds = array<i64: 8, 1>}]} {
    %c0 = arith.constant 0 : index
    %c0_0 = arith.constant 0 : index
    %0 = vector.load %arg1[%c0, %c0_0] : memref<8x1xf32, #tpu.memory_space<vmem>>, vector<8x1xf32>
    %c0_1 = arith.constant 0 : index
    %c0_2 = arith.constant 0 : index
    %1 = vector.load %arg2[%c0_1, %c0_2] : memref<1x1024xf32, #tpu.memory_space<vmem>>, vector<1x1024xf32>
    %2 = vector.broadcast %0 : vector<8x1xf32> to vector<8x1024xf32>
    %3 = vector.broadcast %1 : vector<1x1024xf32> to vector<8x1024xf32>
    %4 = arith.mulf %2, %3 : vector<8x1024xf32>
    %c0_3 = arith.constant 0 : index
    %c0_4 = arith.constant 0 : index
    %5 = vector.load %arg3[%c0_3, %c0_4] : memref<1x1024xf32, #tpu.memory_space<vmem>>, vector<1x1024xf32>
    %6 = vector.broadcast %5 : vector<1x1024xf32> to vector<8x1024xf32>
    %7 = arith.addf %4, %6 : vector<8x1024xf32>
    %cst = arith.constant 0.000000e+00 : f32
    %8 = vector.broadcast %cst : f32 to vector<8x1024xf32>
    %9 = arith.maximumf %7, %8 : vector<8x1024xf32>
    %10 = arith.truncf %9 : vector<8x1024xf32> to vector<8x1024xbf16>
    %c0_5 = arith.constant 0 : index
    %c0_6 = arith.constant 0 : index
    %11 = vector.load %arg4[%c0_5, %c0_6] : memref<1024x128xbf16, #tpu.memory_space<vmem>>, vector<1024x128xbf16>
    %cst_7 = arith.constant dense<0.000000e+00> : vector<8x128xf32>
    %12 = tpu.matmul %10, %11, %cst_7 {dimension_numbers = #tpu.dot_dimension_numbers<[1], [0], [0], [1], [0, 0, 1, 1], [], []>} : vector<8x1024xbf16>, vector<1024x128xbf16>, vector<8x128xf32> -> vector<8x128xf32>
    %c0_8 = arith.constant 0 : index
    %c0_9 = arith.constant 0 : index
    %13 = vector.load %arg5[%c0_8, %c0_9] : memref<1x128xf32, #tpu.memory_space<vmem>>, vector<1x128xf32>
    %14 = vector.broadcast %13 : vector<1x128xf32> to vector<8x128xf32>
    %15 = arith.addf %12, %14 : vector<8x128xf32>
    %cst_10 = arith.constant 0.000000e+00 : f32
    %16 = vector.broadcast %cst_10 : f32 to vector<8x128xf32>
    %17 = arith.maximumf %15, %16 : vector<8x128xf32>
    %c0_11 = arith.constant 0 : index
    %c0_12 = arith.constant 0 : index
    %18 = vector.load %arg6[%c0_11, %c0_12] : memref<1x128xf32, #tpu.memory_space<vmem>>, vector<1x128xf32>
    %19 = vector.broadcast %18 : vector<1x128xf32> to vector<8x128xf32>
    %20 = arith.mulf %17, %19 : vector<8x128xf32>
    %cst_13 = arith.constant dense<0.000000e+00> : vector<8xf32>
    %21 = vector.multi_reduction <add>, %20, %cst_13 [1] : vector<8x128xf32> to vector<8xf32>
    %22 = vector.shape_cast %21 : vector<8xf32> to vector<8x1xf32>
    %c0_14 = arith.constant 0 : index
    %c0_15 = arith.constant 0 : index
    %23 = vector.load %arg7[%c0_14, %c0_15] : memref<1x1xf32, #tpu.memory_space<vmem>>, vector<1x1xf32>
    %24 = vector.broadcast %23 : vector<1x1xf32> to vector<8x1xf32>
    %25 = arith.addf %22, %24 : vector<8x1xf32>
    %c0_16 = arith.constant 0 : index
    %c0_17 = arith.constant 0 : index
    %26 = vector.load %arg8[%c0_16, %c0_17] : memref<8x1xf32, #tpu.memory_space<vmem>>, vector<8x1xf32>
    tpu.vector_store %arg8[%c0_16, %c0_17], %25 {strides = array<i32>} : memref<8x1xf32, #tpu.memory_space<vmem>>, vector<8x1xf32>,
    return
  }
  func.func @transform_0(%arg0: i32) -> (i32, i32) {
    %c0_i32 = arith.constant 0 : i32
    %c0_i32_0 = arith.constant 0 : i32
    return %arg0, %c0_i32 : i32, i32
  }
  func.func @transform_1(%arg0: i32) -> (i32, i32) {
    %c0_i32 = arith.constant 0 : i32
    %c0_i32_0 = arith.constant 0 : i32
    %c0_i32_1 = arith.constant 0 : i32
    return %c0_i32, %c0_i32_0 : i32, i32
  }
  func.func @transform_2(%arg0: i32) -> (i32, i32) {
    %c0_i32 = arith.constant 0 : i32
    %c0_i32_0 = arith.constant 0 : i32
    %c0_i32_1 = arith.constant 0 : i32
    return %c0_i32, %c0_i32_0 : i32, i32
  }
  func.func @transform_3(%arg0: i32) -> (i32, i32) {
    %c0_i32 = arith.constant 0 : i32
    %c0_i32_0 = arith.constant 0 : i32
    %c0_i32_1 = arith.constant 0 : i32
    return %c0_i32, %c0_i32_0 : i32, i32
  }
  func.func @transform_4(%arg0: i32) -> (i32, i32) {
    %c0_i32 = arith.constant 0 : i32
    %c0_i32_0 = arith.constant 0 : i32
    %c0_i32_1 = arith.constant 0 : i32
    return %c0_i32, %c0_i32_0 : i32, i32
  }
  func.func @transform_5(%arg0: i32) -> (i32, i32) {
    %c0_i32 = arith.constant 0 : i32
    %c0_i32_0 = arith.constant 0 : i32
    %c0_i32_1 = arith.constant 0 : i32
    return %c0_i32, %c0_i32_0 : i32, i32
  }
  func.func @transform_6(%arg0: i32) -> (i32, i32) {
    %c0_i32 = arith.constant 0 : i32
    %c0_i32_0 = arith.constant 0 : i32
    %c0_i32_1 = arith.constant 0 : i32
    return %c0_i32, %c0_i32_0 : i32, i32
  }
  func.func @transform_7(%arg0: i32) -> (i32, i32) {
    %c0_i32 = arith.constant 0 : i32
    %c0_i32_0 = arith.constant 0 : i32
    return %arg0, %c0_i32 : i32, i32
  }
}

</mosaic_0001>

<bundles_post_ra>
// kernel: tpu_custom_call.1
= control target key start
LH: loop header
LB: loop body
LE: loop exit
PB: predicated region body
PF: predicated region fallthrough
CT: control target
= control target key end

     0   :  { %s1235_s0 = inlined_call_operand.vmem [shape: f32[8,1], index: 0, kind: input, shape index: {}]   ;;  %s1236_s1 = inlined_call_operand.vmem [shape: f32[1,1024], index: 1, kind: input, shape index: {}]   ;;  %s1237_s2 = inlined_call_operand.vmem [shape: f32[1,1024], index: 2, kind: input, shape index: {}]   ;;  %s1238_s3 = inlined_call_operand.hbm [shape: bf16[1024,128], index: 3, kind: input, shape index: {}]   ;;  %s1239_s4 = inlined_call_operand.vmem [shape: f32[1,128], index: 4, kind: input, shape index: {}]   ;;  %s1240_s5 = inlined_call_operand.vmem [shape: f32[1,128], index: 5, kind: input, shape index: {}]   ;;  %s1241_s6 = inlined_call_operand.<no memory space> [shape: f32[1,1], index: 6, kind: input, shape index: {}]   ;;  %s1242_s7 = inlined_call_operand.vmem [shape: f32[8,1], index: 7, kind: output, shape index: {}]  }
   0x1   :  { %v12_v0 = vstv %s1241_s6 }
   0x2   :  { %13 = vst [vmem:[#allocation2] sm:$0x1] %v12_v0 }
   0x3   :  { %14 = vsyncpa [#allocation4], 0  ;;  %s1118_s26 = smov [#allocation3]   ;;  %s1094_s30 = scalar_lea.hbm %s1238_s3, 8192 }
   0x4   :  { %s26_s27 = sshll.u32 %s1118_s26, 4  ;;  %p1095_p0 = scmp.ne.s32.totalorder %s1238_s3, %s1094_s30  ;;  %s27_s27 = int_to_ptr.vmem [resolvable:$true] %s26_s27 }
   0x5   :  { %p1098_p1 = scmp.lt.u32.totalorder %s1094_s30, %s1238_s3 }
   0x7   :  { %p1100_p2 = pnand %p1098_p1, %p1095_p0 }
   0x9   :  { %1103 = shalt.err (!%p1100_p2)
}
   0xa   :  { %s1104_s6 = scalar_lea.vmem %s27_s27, 8192  ;;  %p1109_p4 = scmp.lt.s32.totalorder %s27_s27, %s27_s27 }
   0xb   :  { %p1105_p3 = scmp.ne.s32.totalorder %s27_s27, %s1104_s6  ;;  %p1110_p5 = scmp.lt.s32.totalorder %s1104_s6, %s1104_s6 }
   0xd   :  { %p1111_p6 = por %p1110_p5, %p1109_p4 }
   0xf   :  { %p1112_p7 = pnand %p1111_p6, %p1105_p3 }
  0x11   :  { %1115 = shalt.err (!%p1112_p7)
}
  0x12   :  { %s1119_s12 = smov 64   ;;  %s1120_s13 = smov 4  }
  0x13   :  { %32 = dma.hbm_to_vmem [thread:$0]  %s1238_s3, 8192, %s27_s27, [#allocation4], %s1119_s12, %s1119_s12, %s1120_s13  }
  0x14   :  { %1116 = dma.done.wait [#allocation4], 8192  }
  0x15   :  { %1117 = vsyncadd [#allocation4], 4294959104  ;;  %v1121_v1 = vmov 0   ;;  %v43_v2 = vld [vmem:[%s1235_s0] sm:$0xff]  ;;  %v1034_v7 = vld [vmem:[#allocation3 + $0x48] sm:$0xff]   ;;  %v51_v37 = vlaneseq  ;;  %vm863_vm0 = vcmask 7168  }
  0x16   :  { %1029 = vset.pattern.permute.xlu0 %v1121_v1  ;;  %v1030_v3 = vld [vmem:[#allocation3 + $0x40] sm:$0xff]   ;;  %v1035_v8 = vld [vmem:[#allocation3 + $0xc8] sm:$0xff]   ;;  %v1038_v11 = vld [vmem:[#allocation3 + $0x50] sm:$0xff]  }
  0x17   :  { %47 = vperm.xlu0 %1029, %v43_v2   ;;  %v1031_v4 = vld [vmem:[#allocation3 + $0xc0] sm:$0xff]   ;;  %937 = vmatprep.subr.bf16.mxu0 %v1030_v3  ;;  %v1036_v9 = vld [vmem:[#allocation3 + $0x8] sm:$0xff]   ;;  %v1039_v12 = vld [vmem:[#allocation3 + $0xd0] sm:$0xff]   ;;  %v1180_v38 = vshrl.u32 %v51_v37, 7 }
  0x18   :  { %v1032_v5 = vld [vmem:[#allocation3] sm:$0xff]   ;;  %959 = vmatprep.subr.bf16.mxu1 %v1031_v4  ;;  %v1037_v10 = vld [vmem:[#allocation3 + $0x88] sm:$0xff]   ;;  %v1040_v13 = vld [vmem:[#allocation3 + $0x10] sm:$0xff]  }
  0x19   :  { %v1033_v6 = vld [vmem:[#allocation3 + $0x80] sm:$0xff]   ;;  %938 = vmatpush3.bf16.msra.mxu0 %v1032_v5  ;;  %v1041_v14 = vld [vmem:[#allocation3 + $0x90] sm:$0xff]   ;;  %v1042_v15 = vld [vmem:[#allocation3 + $0x58] sm:$0xff]   ;;  %v57_v39 = vsub.s32 1, %v1180_v38  ;;  %v65_v40 = vsub.s32 3, %v1180_v38  ;;  %v53_v41 = vsub.s32 0, %v1180_v38 }
  0x1a   :  { %960 = vmatpush3.bf16.msra.mxu1 %v1033_v6  ;;  %939 = vmatprep.subr.bf16.mxu0 %v1034_v7  ;;  %v1043_v16 = vld [vmem:[#allocation3 + $0xd8] sm:$0xff]   ;;  %v1046_v19 = vld [vmem:[#allocation3 + $0x60] sm:$0xff]   ;;  %v1050_v23 = vld [vmem:[#allocation3 + $0x68] sm:$0xff]   ;;  %v61_v42 = vsub.s32 2, %v1180_v38  ;;  %v73_v44 = vsub.s32 5, %v1180_v38  ;;  %v81_v45 = vsub.s32 7, %v1180_v38 }
  0x1b   :  { %961 = vmatprep.subr.bf16.mxu1 %v1035_v8  ;;  %v1044_v17 = vld [vmem:[#allocation3 + $0x18] sm:$0xff]   ;;  %v1047_v20 = vld [vmem:[#allocation3 + $0xe0] sm:$0xff]   ;;  %v1051_v24 = vld [vmem:[#allocation3 + $0xe8] sm:$0xff]   ;;  %v77_v37 = vsub.s32 6, %v1180_v38 }
  0x1c   :  { %v1045_v18 = vld [vmem:[#allocation3 + $0x98] sm:$0xff]   ;;  %v1048_v21 = vld [vmem:[#allocation3 + $0x20] sm:$0xff]   ;;  %v1052_v25 = vld [vmem:[#allocation3 + $0x28] sm:$0xff]  }
  0x1d   :  { %940 = vmatpush3.bf16.msra.mxu0 %v1036_v9  ;;  %v1049_v22 = vld [vmem:[#allocation3 + $0xa0] sm:$0xff]   ;;  %v1053_v26 = vld [vmem:[#allocation3 + $0xa8] sm:$0xff]   ;;  %v1054_v27 = vld [vmem:[#allocation3 + $0x70] sm:$0xff]  }
  0x1e   :  { %962 = vmatpush3.bf16.msra.mxu1 %v1037_v10  ;;  %941 = vmatprep.subr.bf16.mxu0 %v1038_v11  ;;  %v1055_v28 = vld [vmem:[#allocation3 + $0xf0] sm:$0xff]   ;;  %v1058_v31 = vld [vmem:[#allocation3 + $0x78] sm:$0xff]   ;;  %v1062_v35 = vld [vmem:[#allocation3 + $0x140] sm:$0xff]  }
  0x1f   :  { %963 = vmatprep.subr.bf16.mxu1 %v1039_v12  ;;  %v1056_v29 = vld [vmem:[#allocation3 + $0x30] sm:$0xff]   ;;  %v1059_v32 = vld [vmem:[#allocation3 + $0xf8] sm:$0xff]   ;;  %v1063_v36 = vld [vmem:[#allocation3 + $0x1c0] sm:$0xff]  }
  0x20   :  { %v1057_v30 = vld [vmem:[#allocation3 + $0xb0] sm:$0xff]   ;;  %v1060_v33 = vld [vmem:[#allocation3 + $0x38] sm:$0xff]  }
  0x21   :  { %942 = vmatpush3.bf16.msra.mxu0 %v1040_v13  ;;  %v1061_v34 = vld [vmem:[#allocation3 + $0xb8] sm:$0xff]  }
  0x22   :  { %964 = vmatpush3.bf16.msra.mxu1 %v1041_v14  ;;  %943 = vmatprep.subr.bf16.mxu0 %v1042_v15  ;;  %v1189_v43 = vld [vmem:[%s1236_s1] sm:$0xff] }
  0x23   :  { %965 = vmatprep.subr.bf16.mxu1 %v1043_v16  ;;  %v1196_v46 = vld [vmem:[%s1237_s2] sm:$0xff]  ;;  %v58_v47 = vrot.slane %v1189_v43, %v57_v39  ;;  %v66_v48 = vrot.slane %v1189_v43, %v65_v40  ;;  %v54_v49 = vrot.slane %v1189_v43, %v53_v41  ;;  %v62_v50 = vrot.slane %v1189_v43, %v61_v42 }
  0x24   :  { %v74_v51 = vrot.slane %v1189_v43, %v73_v44  ;;  %v82_v52 = vrot.slane %v1189_v43, %v81_v45  ;;  %v108_v53 = vrot.slane %v1196_v46, %v57_v39  ;;  %v116_v54 = vrot.slane %v1196_v46, %v65_v40  ;;  %v1080_v39 = vld [vmem:[#allocation3 + $0x120] sm:$0xff]  }
  0x25   :  { %944 = vmatpush3.bf16.msra.mxu0 %v1044_v17  ;;  %v104_v55 = vrot.slane %v1196_v46, %v53_v41  ;;  %v112_v56 = vrot.slane %v1196_v46, %v61_v42  ;;  %v124_v58 = vrot.slane %v1196_v46, %v73_v44  ;;  %v132_v59 = vrot.slane %v1196_v46, %v81_v45  ;;  %v1081_v40 = vld [vmem:[#allocation3 + $0x1a0] sm:$0xff]   ;;  %v1082_v41 = vld [vmem:[#allocation3 + $0x168] sm:$0xff]  }
  0x26   :  { %966 = vmatpush3.bf16.msra.mxu1 %v1045_v18  ;;  %945 = vmatprep.subr.bf16.mxu0 %v1046_v19  ;;  %v1064_v18 = vld [vmem:[#allocation3 + $0x100] sm:$0xff]   ;;  %v1083_v42 = vld [vmem:[#allocation3 + $0x1e8] sm:$0xff]   ;;  %v78_v45 = vrot.slane %v1189_v43, %v77_v37 }
  0x27   :  { %967 = vmatprep.subr.bf16.mxu1 %v1047_v20  ;;  %v1065_v19 = vld [vmem:[#allocation3 + $0x180] sm:$0xff]   ;;  %v1066_v20 = vld [vmem:[#allocation3 + $0x148] sm:$0xff]  }
  0x29   :  { %946 = vmatpush3.bf16.msra.mxu0 %v1048_v21  ;;  %v1067_v21 = vld [vmem:[#allocation3 + $0x1c8] sm:$0xff]  }
  0x2a   :  { %968 = vmatpush3.bf16.msra.mxu1 %v1049_v22  ;;  %947 = vmatprep.subr.bf16.mxu0 %v1050_v23 }
  0x2b   :  { %969 = vmatprep.subr.bf16.mxu1 %v1051_v24  ;;  %v1068_v24 = vld [vmem:[#allocation3 + $0x108] sm:$0xff]  }
  0x2d   :  { %948 = vmatpush3.bf16.msra.mxu0 %v1052_v25  ;;  %v1069_v25 = vld [vmem:[#allocation3 + $0x188] sm:$0xff]  }
  0x2e   :  { %970 = vmatpush3.bf16.msra.mxu1 %v1053_v26  ;;  %949 = vmatprep.subr.bf16.mxu0 %v1054_v27  ;;  %v1070_v26 = vld [vmem:[#allocation3 + $0x150] sm:$0xff]  }
  0x2f   :  { %971 = vmatprep.subr.bf16.mxu1 %v1055_v28  ;;  %v1071_v27 = vld [vmem:[#allocation3 + $0x1d0] sm:$0xff]  }
  0x30   :  { %v1072_v28 = vld [vmem:[#allocation3 + $0x110] sm:$0xff]  }
  0x31   :  { %950 = vmatpush3.bf16.msra.mxu0 %v1056_v29  ;;  %v1073_v29 = vld [vmem:[#allocation3 + $0x190] sm:$0xff]  }
  0x32   :  { %972 = vmatpush3.bf16.msra.mxu1 %v1057_v30  ;;  %951 = vmatprep.subr.bf16.mxu0 %v1058_v31  ;;  %v1074_v30 = vld [vmem:[#allocation3 + $0x158] sm:$0xff]  }
  0x33   :  { %973 = vmatprep.subr.bf16.mxu1 %v1059_v32  ;;  %v1075_v31 = vld [vmem:[#allocation3 + $0x1d8] sm:$0xff]  }
  0x34   :  { %v1076_v32 = vld [vmem:[#allocation3 + $0x118] sm:$0xff]  }
  0x35   :  { %952 = vmatpush3.bf16.msra.mxu0 %v1060_v33  ;;  %v1077_v33 = vld [vmem:[#allocation3 + $0x198] sm:$0xff]  }
  0x36   :  { %974 = vmatpush3.bf16.msra.mxu1 %v1061_v34  ;;  %981 = vmatprep.subr.bf16.mxu0 %v1062_v35  ;;  %v1078_v34 = vld [vmem:[#allocation3 + $0x160] sm:$0xff]  }
  0x37   :  { %1003 = vmatprep.subr.bf16.mxu1 %v1063_v36  ;;  %v1079_v35 = vld [vmem:[#allocation3 + $0x1e0] sm:$0xff]   ;;  %v69_v36 = vsub.s32 4, %v1180_v38  ;;  %v1086_v38 = vld [vmem:[#allocation3 + $0x170] sm:$0xff]  }
  0x39   :  { %v70_v44 = vrot.slane %v1189_v43, %v69_v36  ;;  %v1089_v43 = vld [vmem:[#allocation3 + $0x1b0] sm:$0xff]  }
  0x96   :  { %v1208_v57 = vpop.permute.xlu0 %47 }
  0x97   :  { %v92_v60 = vmul.f32 %v58_v47, %v1208_v57  ;;  %v94_v61 = vmul.f32 %v66_v48, %v1208_v57  ;;  %v91_v62 = vmul.f32 %v54_v49, %v1208_v57  ;;  %v93_v63 = vmul.f32 %v62_v50, %v1208_v57  ;;  %v1084_v47 = vld [vmem:[#allocation3 + $0x128] sm:$0xff]   ;;  %v1087_v50 = vld [vmem:[#allocation3 + $0x1f0] sm:$0xff]  }
  0x98   :  { %v96_v0 = vmul.f32 %v74_v51, %v1208_v57  ;;  %v98_v1 = vmul.f32 %v82_v52, %v1208_v57  ;;  %v1085_v48 = vld [vmem:[#allocation3 + $0x1a8] sm:$0xff]   ;;  %v120_v49 = vrot.slane %v1196_v46, %v69_v36  ;;  %v95_v51 = vmul.f32 %v70_v44, %v1208_v57 }
  0x99   :  { %v142_v2 = vadd.f32 %v108_v53, %v92_v60  ;;  %v144_v3 = vadd.f32 %v116_v54, %v94_v61  ;;  %v141_v4 = vadd.f32 %v104_v55, %v91_v62  ;;  %v143_v5 = vadd.f32 %v112_v56, %v93_v63  ;;  %v1088_v54 = vld [vmem:[#allocation3 + $0x130] sm:$0xff]   ;;  %v1090_v55 = vld [vmem:[#allocation3 + $0x178] sm:$0xff]  }
  0x9a   :  { %v146_v6 = vadd.f32 %v124_v58, %v96_v0  ;;  %v148_v7 = vadd.f32 %v132_v59, %v98_v1  ;;  %v97_v52 = vmul.f32 %v78_v45, %v1208_v57  ;;  %v128_v53 = vrot.slane %v1196_v46, %v77_v37  ;;  %v1091_v56 = vld [vmem:[#allocation3 + $0x1f8] sm:$0xff]  }
  0x9b   :  { %v150_v8 = vmax.f32 %v142_v2, 0.0  ;;  %v152_v9 = vmax.f32 %v144_v3, 0.0  ;;  %v149_v10 = vmax.f32 %v141_v4, 0.0  ;;  %v151_v11 = vmax.f32 %v143_v5, 0.0  ;;  %v1092_v60 = vld [vmem:[#allocation3 + $0x138] sm:$0xff]  }
  0x9c   :  { %v154_v12 = vmax.f32 %v146_v6, 0.0  ;;  %v156_v13 = vmax.f32 %v148_v7, 0.0  ;;  %v145_v58 = vadd.f32 %v120_v49, %v95_v51  ;;  %v147_v59 = vadd.f32 %v128_v53, %v97_v52  ;;  %v1093_v61 = vld [vmem:[#allocation3 + $0x1b8] sm:$0xff]  }
  0x9d   :  { %v158_v14 = vpack.c.bf16 %v150_v8, %v150_v8  ;;  %v160_v15 = vpack.c.bf16 %v152_v9, %v152_v9  ;;  %v157_v16 = vpack.c.bf16 %v149_v10, %v149_v10  ;;  %v159_v17 = vpack.c.bf16 %v151_v11, %v151_v11  ;;  %v870_v2 = vld [vmem:[%s1239_s4] ss:$0 sm:$0xff] }
  0x9e   :  { %v162_v22 = vpack.c.bf16 %v154_v12, %v154_v12  ;;  %v164_v23 = vpack.c.bf16 %v156_v13, %v156_v13  ;;  %v153_v62 = vmax.f32 %v145_v58, 0.0  ;;  %v155_v57 = vmax.f32 %v147_v59, 0.0 }
  0x9f   :  { %716 = vmatprep.mubr.bf16.mxu0 %v158_v14  ;;  %756 = vmatprep.mubr.bf16.mxu1 %v160_v15 }
  0xa0   :  { %717 = vmatmul.mubr.bf16.vlgmr.msra.gmra.mrb[0].mxu0 %v157_v16  ;;  %757 = vmatmul.mubr.bf16.vlgmr.msra.gmra.mrb[0].mxu1 %v159_v17  ;;  %v161_v46 = vpack.c.bf16 %v153_v62, %v153_v62  ;;  %v163_v63 = vpack.c.bf16 %v155_v57, %v155_v57 }
  0xa1   :  { %982 = vmatpush3.bf16.msra.mxu0 %v1064_v18  ;;  %1004 = vmatpush3.bf16.msra.mxu1 %v1065_v19 }
  0xa2   :  { %796 = vmatprep.mubr.bf16.mxu0 %v162_v22  ;;  %836 = vmatprep.mubr.bf16.mxu1 %v164_v23 }
  0xa3   :  { %983 = vmatprep.subr.bf16.mxu0 %v1066_v20  ;;  %1005 = vmatprep.subr.bf16.mxu1 %v1067_v21 }
  0xa5   :  { %984 = vmatpush3.bf16.msra.mxu0 %v1068_v24  ;;  %1006 = vmatpush3.bf16.msra.mxu1 %v1069_v25  ;;  %v935_v25 = vld [vmem:[%s1240_s5] ss:$0 sm:$0xff] }
  0xa6   :  { %985 = vmatprep.subr.bf16.mxu0 %v1070_v26  ;;  %1007 = vmatprep.subr.bf16.mxu1 %v1071_v27 }
  0xa9   :  { %986 = vmatpush3.bf16.msra.mxu0 %v1072_v28  ;;  %1008 = vmatpush3.bf16.msra.mxu1 %v1073_v29  ;;  %v936_v28 = vld [vmem:[#allocation2] ss:$0 sm:$0xff] }
  0xaa   :  { %987 = vmatprep.subr.bf16.mxu0 %v1074_v30  ;;  %1009 = vmatprep.subr.bf16.mxu1 %v1075_v31 }
  0xad   :  { %988 = vmatpush3.bf16.msra.mxu0 %v1076_v32  ;;  %1010 = vmatpush3.bf16.msra.mxu1 %v1077_v33 }
  0xae   :  { %989 = vmatprep.subr.bf16.mxu0 %v1078_v34  ;;  %1011 = vmatprep.subr.bf16.mxu1 %v1079_v35 }
  0xb1   :  { %990 = vmatpush3.bf16.msra.mxu0 %v1080_v39  ;;  %1012 = vmatpush3.bf16.msra.mxu1 %v1081_v40 }
  0xb2   :  { %991 = vmatprep.subr.bf16.mxu0 %v1082_v41  ;;  %1013 = vmatprep.subr.bf16.mxu1 %v1083_v42 }
  0xb5   :  { %992 = vmatpush3.bf16.msra.mxu0 %v1084_v47  ;;  %1014 = vmatpush3.bf16.msra.mxu1 %v1085_v48 }
  0xb6   :  { %993 = vmatprep.subr.bf16.mxu0 %v1086_v38  ;;  %1015 = vmatprep.subr.bf16.mxu1 %v1087_v50 }
  0xb9   :  { %994 = vmatpush3.bf16.msra.mxu0 %v1088_v54  ;;  %1016 = vmatpush3.bf16.msra.mxu1 %v1089_v43 }
  0xba   :  { %995 = vmatprep.subr.bf16.mxu0 %v1090_v55  ;;  %1017 = vmatprep.subr.bf16.mxu1 %v1091_v56 }
  0xbd   :  { %996 = vmatpush3.bf16.msra.mxu0 %v1092_v60  ;;  %1018 = vmatpush3.bf16.msra.mxu1 %v1093_v61 }
  0xc0   :  { %797 = vmatmul.mubr.bf16.vlgmr.msra.gmra.mrb[4].mxu0 %v161_v46  ;;  %837 = vmatmul.mubr.bf16.vlgmr.msra.gmra.mrb[4].mxu1 %v163_v63 }
 0x173   :  { %v953_v0 = vpop.f32.mrb[0].mxu0  ;;  %v975_v1 = vpop.f32.mrb[0].mxu1 }
 0x174   :  { %v954_v3 = vpop.f32.mrb[1].mxu0  ;;  %v976_v4 = vpop.f32.mrb[1].mxu1 }
 0x175   :  { %v955_v5 = vadd.f32 %v954_v3, %v953_v0  ;;  %v977_v6 = vadd.f32 %v976_v4, %v975_v1  ;;  %v956_v7 = vpop.f32.mrb[2].mxu0  ;;  %v978_v8 = vpop.f32.mrb[2].mxu1 }
 0x176   :  { %v957_v9 = vpop.f32.mrb[3].mxu0  ;;  %v979_v10 = vpop.f32.mrb[3].mxu1 }
 0x177   :  { %v719_v11 = vadd.f32 %v955_v5, %v870_v2 }
 0x179   :  { %v759_v12 = vadd.f32 %v977_v6, %v719_v11 }
 0x193   :  { %v997_v13 = vpop.f32.mrb[4].mxu0  ;;  %v1019_v14 = vpop.f32.mrb[4].mxu1 }
 0x194   :  { %v998_v15 = vpop.f32.mrb[5].mxu0  ;;  %v1020_v16 = vpop.f32.mrb[5].mxu1 }
 0x195   :  { %v999_v17 = vadd.f32 %v998_v15, %v997_v13  ;;  %v1021_v18 = vadd.f32 %v1020_v16, %v1019_v14  ;;  %v1000_v19 = vpop.f32.mrb[6].mxu0  ;;  %v1022_v20 = vpop.f32.mrb[6].mxu1 }
 0x196   :  { %v1001_v21 = vpop.f32.mrb[7].mxu0  ;;  %v1023_v22 = vpop.f32.mrb[7].mxu1 }
 0x197   :  { %v799_v23 = vadd.f32 %v999_v17, %v759_v12 }
 0x199   :  { %v839_v24 = vadd.f32 %v1021_v18, %v799_v23 }
 0x19b   :  { %v844_v26 = vmax.f32 %v839_v24, 0.0 }
 0x19d   :  { %v852_v27 = vmul.f32 %v935_v25, %v844_v26 }
 0x19f   :  { %853 = vadd.xlane.f32.xlu0 %v852_v27 }
 0x22c   :  { %v854_v29 = vpop.xlane.xlu0 %853 }
 0x22d   :  { %v862_v30 = vadd.f32 %v936_v28, %v854_v29 }
 0x22f   :  { %864 = vst.msk [vmem:[%s1242_s7] sm:$0xff] %vm863_vm0, %v862_v30 }
 0x230   :  { %869 = vsyncpa [#allocation4], 1 }

</bundles_post_ra>
